<compile_context>
chip_gen: v7x
topology: tpu7x:2x2x1
jax: 0.10.0
libtpu: 0.0.40
codegen_flags: <defaults>
</compile_context>

<pallas_src>
import functools

import jax
import jax.numpy as jnp
from jax.experimental import pallas as pl
from jax.experimental.pallas import tpu as pltpu

NEG = -1e30  # padding value for fake class lanes (exp underflows to exactly 0)


def _round_up(x, m):
    return (x + m - 1) // m * m


def _partial_tile(partial):
    """Scalar -> (8,128) lane-dense tile with the value at [0,0], zeros elsewhere."""
    r = jax.lax.broadcasted_iota(jnp.int32, (8, 128), 0)
    c = jax.lax.broadcasted_iota(jnp.int32, (8, 128), 1)
    return jnp.where((r == 0) & (c == 0), partial, 0.0).astype(jnp.float32)


def _logsumexp(a):
    m = jnp.max(a, axis=1, keepdims=True)
    return m + jnp.log(jnp.sum(jnp.exp(a - m), axis=1, keepdims=True))


# ----------------------------------------------------------------------------
# Fused kernel: teacher Linear (K-tiled matmul) + base CE + distillation term.
# ----------------------------------------------------------------------------
def _fused_kernel(x_ref, w_ref, b_ref, cls_ref, kd_ref, lab_ref,
                  part_ref, t_acc_ref, *,
                  distillation_type, alpha, tau, use_ce, b_true, c_true, tb):
    i = pl.program_id(0)          # batch tile
    k = pl.program_id(1)          # contraction (D) tile
    nk = pl.num_programs(1)

    @pl.when(k == 0)
    def _():
        t_acc_ref[...] = jnp.zeros_like(t_acc_ref)

    # Teacher matmul: bf16 x bf16 -> f32 accumulation on the MXU.
    t_acc_ref[...] += jnp.dot(x_ref[...], w_ref[...],
                              preferred_element_type=jnp.float32)

    @pl.when(k == nk - 1)
    def _():
        Cp = cls_ref.shape[1]
        t = t_acc_ref[...] + b_ref[...]                  # teacher logits (tb, Cp)
        z = cls_ref[...].astype(jnp.float32)             # student class-token logits
        kd = kd_ref[...].astype(jnp.float32)             # student distill-token logits
        labels = lab_ref[...]                            # (tb, 1) int32

        cls_ids = jax.lax.broadcasted_iota(jnp.int32, (tb, Cp), 1)
        row_ids = i * tb + jax.lax.broadcasted_iota(jnp.int32, (tb, 1), 0)
        row_mask = (row_ids < b_true).astype(jnp.float32)

        # ---- base criterion: CrossEntropyLoss(outputs, labels), mean over batch
        lse_z = _logsumexp(z)
        z_lab = jnp.sum(jnp.where(cls_ids == labels, z, 0.0), axis=1, keepdims=True)
        base_partial = jnp.sum((lse_z - z_lab) * row_mask) / b_true

        # ---- distillation term
        if distillation_type == "soft":
            inv_t = 1.0 / tau
            s_t = t * inv_t
            s_q = kd * inv_t
            # teacher softmax: reuse exp from logsumexp (single exp pass)
            m_t = jnp.max(s_t, axis=1, keepdims=True)
            e_t = jnp.exp(s_t - m_t)
            den_t = jnp.sum(e_t, axis=1, keepdims=True)
            log_p = (s_t - m_t) - jnp.log(den_t)
            p = e_t * pl.reciprocal(den_t, approx=True)
            # student log-softmax
            m_q = jnp.max(s_q, axis=1, keepdims=True)
            e_q = jnp.exp(s_q - m_q)
            log_q = (s_q - m_q) - jnp.log(jnp.sum(e_q, axis=1, keepdims=True))
            if use_ce:
                # ce_loss(teacher/T, kd/T) * T*T  (mean over batch)
                per = jnp.sum(-p * log_q, axis=1, keepdims=True)
                distill_partial = jnp.sum(per * row_mask) * (tau * tau) / b_true
            else:
                # F.kl_div(log_q, log_p, reduction='sum', log_target=True) * T*T / numel
                per = jnp.sum(p * (log_p - log_q), axis=1, keepdims=True)
                distill_partial = (jnp.sum(per * row_mask) * (tau * tau)
                                   / float(b_true * c_true))
        else:  # 'hard'
            # cross_entropy(kd, argmax(teacher)); first-occurrence tie-break.
            t_max = jnp.max(t, axis=1, keepdims=True)
            idx = jnp.min(jnp.where(t == t_max, cls_ids, Cp), axis=1, keepdims=True)
            lse_kd = _logsumexp(kd)
            kd_sel = jnp.sum(jnp.where(cls_ids == idx, kd, 0.0), axis=1, keepdims=True)
            distill_partial = jnp.sum((lse_kd - kd_sel) * row_mask) / b_true

        partial = base_partial * (1.0 - alpha) + distill_partial * alpha
        part_ref[...] = _partial_tile(partial)[None]


def _distill_loss_fused(x_flat, w_bf16, b_f32, outputs, outputs_kd, labels, *,
                        distillation_type, alpha, tau, use_ce):
    B, C = outputs.shape
    D = x_flat.shape[1]

    Cp = _round_up(C, 128)
    tb = min(256, _round_up(B, 8))
    Bp = _round_up(B, tb)
    tk = min(512, _round_up(D, 128))
    Dp = _round_up(D, tk)
    nb, nk = Bp // tb, Dp // tk

    # --- pad operands (class lanes -> NEG logits, batch/K -> zeros) ---
    x_p = jnp.pad(x_flat.astype(jnp.bfloat16), ((0, Bp - B), (0, Dp - D)))
    w_p = jnp.pad(w_bf16, ((0, Dp - D), (0, Cp - C)))
    b_p = jnp.pad(b_f32.reshape(1, C), ((0, 0), (0, Cp - C)), constant_values=NEG)

    def pad_logits(a):
        a = jnp.pad(a.astype(jnp.float32), ((0, 0), (0, Cp - C)), constant_values=NEG)
        return jnp.pad(a, ((0, Bp - B), (0, 0)))

    cls_p = pad_logits(outputs)
    kd_p = pad_logits(outputs_kd)
    lab_p = jnp.pad(labels.astype(jnp.int32).reshape(B, 1), ((0, Bp - B), (0, 0)))

    kernel = functools.partial(
        _fused_kernel, distillation_type=distillation_type, alpha=float(alpha),
        tau=float(tau), use_ce=use_ce, b_true=B, c_true=C, tb=tb)

    partials = pl.pallas_call(
        kernel,
        out_shape=jax.ShapeDtypeStruct((nb, 8, 128), jnp.float32),
        grid_spec=pltpu.PrefetchScalarGridSpec(
            num_scalar_prefetch=0,
            grid=(nb, nk),
            in_specs=[
                pl.BlockSpec((tb, tk), lambda i, k: (i, k)),   # x (bf16)
                pl.BlockSpec((tk, Cp), lambda i, k: (k, 0)),   # teacher W (bf16)
                pl.BlockSpec((1, Cp), lambda i, k: (0, 0)),    # teacher b (f32)
                pl.BlockSpec((tb, Cp), lambda i, k: (i, 0)),   # student class logits
                pl.BlockSpec((tb, Cp), lambda i, k: (i, 0)),   # student distill logits
                pl.BlockSpec((tb, 1), lambda i, k: (i, 0)),    # labels
            ],
            out_specs=pl.BlockSpec((1, 8, 128), lambda i, k: (i, 0, 0)),
            scratch_shapes=[pltpu.VMEM((tb, Cp), jnp.float32)],
        ),
        compiler_params=pltpu.CompilerParams(
            dimension_semantics=("parallel", "arbitrary")),
    )(x_p, w_p, b_p, cls_p, kd_p, lab_p)

    return jnp.sum(partials)


# ----------------------------------------------------------------------------
# distillation_type == 'none': base CrossEntropy only (no dead kd/teacher DMAs).
# ----------------------------------------------------------------------------
def _base_ce_kernel(cls_ref, lab_ref, part_ref, *, b_true, tb):
    i = pl.program_id(0)
    Cp = cls_ref.shape[1]
    z = cls_ref[...].astype(jnp.float32)
    labels = lab_ref[...]
    cls_ids = jax.lax.broadcasted_iota(jnp.int32, (tb, Cp), 1)
    row_ids = i * tb + jax.lax.broadcasted_iota(jnp.int32, (tb, 1), 0)
    row_mask = (row_ids < b_true).astype(jnp.float32)
    lse_z = _logsumexp(z)
    z_lab = jnp.sum(jnp.where(cls_ids == labels, z, 0.0), axis=1, keepdims=True)
    partial = jnp.sum((lse_z - z_lab) * row_mask) / b_true
    part_ref[...] = _partial_tile(partial)[None]


def _base_ce_loss(outputs, labels):
    B, C = outputs.shape
    Cp = _round_up(C, 128)
    tb = min(256, _round_up(B, 8))
    Bp = _round_up(B, tb)
    nb = Bp // tb

    cls_p = jnp.pad(outputs.astype(jnp.float32), ((0, 0), (0, Cp - C)),
                    constant_values=NEG)
    cls_p = jnp.pad(cls_p, ((0, Bp - B), (0, 0)))
    lab_p = jnp.pad(labels.astype(jnp.int32).reshape(B, 1), ((0, Bp - B), (0, 0)))

    kernel = functools.partial(_base_ce_kernel, b_true=B, tb=tb)
    partials = pl.pallas_call(
        kernel,
        out_shape=jax.ShapeDtypeStruct((nb, 8, 128), jnp.float32),
        grid_spec=pltpu.PrefetchScalarGridSpec(
            num_scalar_prefetch=0,
            grid=(nb,),
            in_specs=[pl.BlockSpec((tb, Cp), lambda i: (i, 0)),
                      pl.BlockSpec((tb, 1), lambda i: (i, 0))],
            out_specs=pl.BlockSpec((1, 8, 128), lambda i: (i, 0, 0)),
        ),
        compiler_params=pltpu.CompilerParams(dimension_semantics=("parallel",)),
    )(cls_p, lab_p)
    return jnp.sum(partials)


# ----------------------------------------------------------------------------
# Module wrapper (mirrors torch DistillationLoss.forward).
# ----------------------------------------------------------------------------
class DistillationLoss:
    def __init__(self, teacher_w, teacher_b, distillation_type, alpha, tau,
                 use_ce=False, distill_token=True):
        assert distillation_type in ("none", "soft", "hard")
        # Teacher is no-grad -> store weights in bf16 (2x less DMA, 3x MXU rate).
        self.teacher_w = teacher_w.astype(jnp.bfloat16)
        self.teacher_b = teacher_b.astype(jnp.float32)
        self.distillation_type = distillation_type
        self.alpha = alpha
        self.tau = tau
        self.use_ce = use_ce
        self.distill_token = distill_token

    def __call__(self, inputs, outputs, labels):
        outputs_kd = None
        if self.distill_token:
            if isinstance(outputs, (tuple, list)):
                outputs, outputs_kd = outputs
        else:
            outputs_kd = outputs

        if self.distillation_type == "none":
            return _base_ce_loss(outputs, labels)

        if outputs_kd is None:
            raise ValueError(
                "When knowledge distillation is enabled, the model is expected to "
                "return a Tuple[Tensor, Tensor]")

        B = inputs.shape[0]
        x_flat = inputs.reshape(B, -1)
        return _distill_loss_fused(
            x_flat, self.teacher_w, self.teacher_b, outputs, outputs_kd, labels,
            distillation_type=self.distillation_type, alpha=self.alpha,
            tau=self.tau, use_ce=self.use_ce)


# ----------------------------------------------------------------------------
# Pure-JAX reference (for sanity checking).
# ----------------------------------------------------------------------------
def _reference_loss(inputs, outputs, outputs_kd, labels, w_bf16, b_f32,
                    distillation_type, alpha, tau, use_ce):
    B = inputs.shape[0]
    z = outputs.astype(jnp.float32)
    lse = jax.scipy.special.logsumexp(z, axis=1)
    base = jnp.mean(lse - z[jnp.arange(B), labels])
    if distillation_type == "none":
        return base
    x = inputs.reshape(B, -1).astype(jnp.bfloat16)
    t = jnp.dot(x, w_bf16, preferred_element_type=jnp.float32) + b_f32
    kd = outputs_kd.astype(jnp.float32)
    if distillation_type == "soft":
        log_q = jax.nn.log_softmax(kd / tau, axis=1)
        log_p = jax.nn.log_softmax(t / tau, axis=1)
        if use_ce:
            dist = jnp.mean(jnp.sum(-jnp.exp(log_p) * log_q, axis=1)) * tau * tau
        else:
            dist = (jnp.sum(jnp.exp(log_p) * (log_p - log_q)) * tau * tau
                    / float(kd.size))
    else:
        tgt = jnp.argmax(t, axis=1)
        lse_kd = jax.scipy.special.logsumexp(kd, axis=1)
        dist = jnp.mean(lse_kd - kd[jnp.arange(B), tgt])
    return base * (1.0 - alpha) + dist * alpha


if __name__ == "__main__":
    B, Cin, H, W = 8, 3, 8, 8
    num_classes = 128
    D = Cin * H * W

    key = jax.random.PRNGKey(0)
    k_in, k_cls, k_kd, k_lab, k_w, k_b = jax.random.split(key, 6)

    inputs = jax.random.normal(k_in, (B, Cin, H, W), dtype=jnp.float32)      # NCHW
    outputs_cls = jax.random.normal(k_cls, (B, num_classes), dtype=jnp.float32)
    outputs_kd = jax.random.normal(k_kd, (B, num_classes), dtype=jnp.float32)
    labels = jax.random.randint(k_lab, (B,), 0, num_classes, dtype=jnp.int32)

    teacher_w = jax.random.normal(k_w, (D, num_classes), dtype=jnp.float32) * 0.05
    teacher_b = jax.random.normal(k_b, (num_classes,), dtype=jnp.float32) * 0.01

    # --- soft distillation (KL) ---
    crit_soft = DistillationLoss(teacher_w, teacher_b, "soft", alpha=0.5, tau=2.0,
                                 use_ce=False, distill_token=True)
    loss_soft = jax.block_until_ready(crit_soft(inputs, (outputs_cls, outputs_kd), labels))
    ref_soft = _reference_loss(inputs, outputs_cls, outputs_kd, labels,
                               crit_soft.teacher_w, crit_soft.teacher_b,
                               "soft", 0.5, 2.0, False)
    assert bool(jnp.isfinite(loss_soft))
    assert bool(jnp.allclose(loss_soft, ref_soft, rtol=5e-2, atol=1e-2)), (
        loss_soft, ref_soft)

    # --- hard distillation ---
    crit_hard = DistillationLoss(teacher_w, teacher_b, "hard", alpha=0.5, tau=1.0,
                                 use_ce=False, distill_token=True)
    loss_hard = jax.block_until_ready(crit_hard(inputs, (outputs_cls, outputs_kd), labels))
    assert bool(jnp.isfinite(loss_hard))

    # --- no distillation (base CE only) ---
    crit_none = DistillationLoss(teacher_w, teacher_b, "none", alpha=0.5, tau=1.0)
    loss_none = jax.block_until_ready(crit_none(inputs, (outputs_cls, outputs_kd), labels))
    ref_none = _reference_loss(inputs, outputs_cls, outputs_kd, labels,
                               crit_none.teacher_w, crit_none.teacher_b,
                               "none", 0.5, 1.0, False)
    assert bool(jnp.isfinite(loss_none))
    assert bool(jnp.allclose(loss_none, ref_none, rtol=1e-4, atol=1e-4)), (
        loss_none, ref_none)

    print("KERNEL_OK")
</pallas_src>

<mosaic_0001>
module attributes {stable_mosaic.version = 11 : i64} {
  func.func @_fused_kernel(%arg0: i32, %arg1: i32, %arg2: memref<8x256xbf16, #tpu.memory_space<vmem>>, %arg3: memref<256x128xbf16, #tpu.memory_space<vmem>>, %arg4: memref<1x128xf32, #tpu.memory_space<vmem>>, %arg5: memref<8x128xf32, #tpu.memory_space<vmem>>, %arg6: memref<8x128xf32, #tpu.memory_space<vmem>>, %arg7: memref<8x1xi32, #tpu.memory_space<vmem>>, %arg8: memref<1x8x128xf32, #tpu.memory_space<vmem>>, %arg9: memref<8x128xf32, #tpu.memory_space<vmem>>) attributes {dimension_semantics = [#tpu.dimension_semantics<parallel>, #tpu.dimension_semantics<arbitrary>], iteration_bounds = array<i64: 1, 1>, scalar_prefetch = 0 : i64, scratch_operands = 1 : i64, tpu.core_type = #tpu.core_type<tc>, window_params = [{transform_indices = @transform_0, window_bounds = array<i64: 8, 256>}, {transform_indices = @transform_1, window_bounds = array<i64: 256, 128>}, {pipeline_mode = #tpu.pipeline_mode<synchronous>, transform_indices = @transform_2, window_bounds = array<i64: 1, 128>}, {transform_indices = @transform_3, window_bounds = array<i64: 8, 128>}, {transform_indices = @transform_4, window_bounds = array<i64: 8, 128>}, {transform_indices = @transform_5, window_bounds = array<i64: 8, 1>}, {transform_indices = @transform_6, window_bounds = array<i64: 1, 8, 128>}]} {
    %c0_i32 = arith.constant 0 : i32
    %0 = arith.cmpi eq, %arg1, %c0_i32 : i32
    %1 = arith.extui %0 : i1 to i32
    %c0_i32_0 = arith.constant 0 : i32
    %2 = arith.cmpi ne, %1, %c0_i32_0 : i32
    scf.if %2 {
      %cst_10 = arith.constant 0.000000e+00 : f32
      %12 = vector.broadcast %cst_10 : f32 to vector<8x128xf32>
      %c0_11 = arith.constant 0 : index
      %c0_12 = arith.constant 0 : index
      %13 = vector.load %arg9[%c0_11, %c0_12] : memref<8x128xf32, #tpu.memory_space<vmem>>, vector<8x128xf32>
      tpu.vector_store %arg9[%c0_11, %c0_12], %12 {strides = array<i32>} : memref<8x128xf32, #tpu.memory_space<vmem>>, vector<8x128xf32>,
    } else {
    }
    %c0 = arith.constant 0 : index
    %c0_1 = arith.constant 0 : index
    %3 = vector.load %arg9[%c0, %c0_1] : memref<8x128xf32, #tpu.memory_space<vmem>>, vector<8x128xf32>
    %c0_2 = arith.constant 0 : index
    %c0_3 = arith.constant 0 : index
    %4 = vector.load %arg2[%c0_2, %c0_3] : memref<8x256xbf16, #tpu.memory_space<vmem>>, vector<8x256xbf16>
    %c0_4 = arith.constant 0 : index
    %c0_5 = arith.constant 0 : index
    %5 = vector.load %arg3[%c0_4, %c0_5] : memref<256x128xbf16, #tpu.memory_space<vmem>>, vector<256x128xbf16>
    %cst = arith.constant dense<0.000000e+00> : vector<8x128xf32>
    %6 = tpu.matmul %4, %5, %cst {dimension_numbers = #tpu.dot_dimension_numbers<[1], [0], [0], [1], [0, 0, 1, 1], [], []>} : vector<8x256xbf16>, vector<256x128xbf16>, vector<8x128xf32> -> vector<8x128xf32>
    %7 = arith.addf %3, %6 : vector<8x128xf32>
    %c0_6 = arith.constant 0 : index
    %c0_7 = arith.constant 0 : index
    %8 = vector.load %arg9[%c0_6, %c0_7] : memref<8x128xf32, #tpu.memory_space<vmem>>, vector<8x128xf32>
    tpu.vector_store %arg9[%c0_6, %c0_7], %7 {strides = array<i32>} : memref<8x128xf32, #tpu.memory_space<vmem>>, vector<8x128xf32>,
    %c0_i32_8 = arith.constant 0 : i32
    %9 = arith.cmpi eq, %arg1, %c0_i32_8 : i32
    %10 = arith.extui %9 : i1 to i32
    %c0_i32_9 = arith.constant 0 : i32
    %11 = arith.cmpi ne, %10, %c0_i32_9 : i32
    scf.if %11 {
      %c0_10 = arith.constant 0 : index
      %c0_11 = arith.constant 0 : index
      %12 = vector.load %arg9[%c0_10, %c0_11] : memref<8x128xf32, #tpu.memory_space<vmem>>, vector<8x128xf32>
      %c0_12 = arith.constant 0 : index
      %c0_13 = arith.constant 0 : index
      %13 = vector.load %arg4[%c0_12, %c0_13] : memref<1x128xf32, #tpu.memory_space<vmem>>, vector<1x128xf32>
      %14 = vector.broadcast %13 : vector<1x128xf32> to vector<8x128xf32>
      %15 = arith.addf %12, %14 : vector<8x128xf32>
      %c0_14 = arith.constant 0 : index
      %c0_15 = arith.constant 0 : index
      %16 = vector.load %arg5[%c0_14, %c0_15] : memref<8x128xf32, #tpu.memory_space<vmem>>, vector<8x128xf32>
      %c0_16 = arith.constant 0 : index
      %c0_17 = arith.constant 0 : index
      %17 = vector.load %arg6[%c0_16, %c0_17] : memref<8x128xf32, #tpu.memory_space<vmem>>, vector<8x128xf32>
      %c0_18 = arith.constant 0 : index
      %c0_19 = arith.constant 0 : index
      %18 = vector.load %arg7[%c0_18, %c0_19] : memref<8x1xi32, #tpu.memory_space<vmem>>, vector<8x1xi32>
      %19 = tpu.iota {dimensions = array<i32: 1>} : vector<8x128xi32>
      %c8_i32 = arith.constant 8 : i32
      %20 = arith.muli %arg0, %c8_i32 : i32
      %21 = tpu.iota {dimensions = array<i32: 0>} : vector<8x1xi32>
      %22 = vector.broadcast %20 : i32 to vector<8x1xi32>
      %23 = arith.addi %22, %21 : vector<8x1xi32>
      %c8_i32_20 = arith.constant 8 : i32
      %24 = vector.broadcast %c8_i32_20 : i32 to vector<8x1xi32>
      %25 = arith.cmpi slt, %23, %24 : vector<8x1xi32>
      %26 = arith.extui %25 : vector<8x1xi1> to vector<8x1xi32>
      %27 = arith.sitofp %26 : vector<8x1xi32> to vector<8x1xf32>
      %cst_21 = arith.constant dense<0xFF800000> : vector<8xf32>
      %28 = vector.multi_reduction <maximumf>, %16, %cst_21 [1] : vector<8x128xf32> to vector<8xf32>
      %29 = vector.shape_cast %28 : vector<8xf32> to vector<8x1xf32>
      %30 = vector.broadcast %29 : vector<8x1xf32> to vector<8x128xf32>
      %31 = arith.subf %16, %30 : vector<8x128xf32>
      %32 = math.exp %31 : vector<8x128xf32>
      %cst_22 = arith.constant dense<0.000000e+00> : vector<8xf32>
      %33 = vector.multi_reduction <add>, %32, %cst_22 [1] : vector<8x128xf32> to vector<8xf32>
      %34 = vector.shape_cast %33 : vector<8xf32> to vector<8x1xf32>
      %35 = math.log %34 : vector<8x1xf32>
      %36 = arith.addf %29, %35 : vector<8x1xf32>
      %37 = vector.broadcast %18 : vector<8x1xi32> to vector<8x128xi32>
      %38 = arith.cmpi eq, %19, %37 : vector<8x128xi32>
      %cst_23 = arith.constant 0.000000e+00 : f32
      %39 = vector.broadcast %cst_23 : f32 to vector<8x128xf32>
      %40 = arith.select %38, %16, %39 : vector<8x128xi1>, vector<8x128xf32>
      %cst_24 = arith.constant dense<0.000000e+00> : vector<8xf32>
      %41 = vector.multi_reduction <add>, %40, %cst_24 [1] : vector<8x128xf32> to vector<8xf32>
      %42 = vector.shape_cast %41 : vector<8xf32> to vector<8x1xf32>
      %43 = arith.subf %36, %42 : vector<8x1xf32>
      %44 = arith.mulf %43, %27 : vector<8x1xf32>
      %45 = vector.shape_cast %44 : vector<8x1xf32> to vector<1x8x1xf32>
      %cst_25 = arith.constant dense<0.000000e+00> : vector<1xf32>
      %46 = vector.multi_reduction <add>, %45, %cst_25 [1, 2] : vector<1x8x1xf32> to vector<1xf32>
      %47 = vector.shape_cast %46 : vector<1xf32> to vector<1x1x1xf32>
      %48 = vector.extract %47[0, 0, 0] : f32 from vector<1x1x1xf32>
      %cst_26 = arith.constant 8.000000e+00 : f32
      %49 = arith.divf %48, %cst_26 : f32
      %cst_27 = arith.constant 5.000000e-01 : f32
      %50 = vector.broadcast %cst_27 : f32 to vector<8x128xf32>
      %51 = arith.mulf %15, %50 : vector<8x128xf32>
      %cst_28 = arith.constant 5.000000e-01 : f32
      %52 = vector.broadcast %cst_28 : f32 to vector<8x128xf32>
      %53 = arith.mulf %17, %52 : vector<8x128xf32>
      %cst_29 = arith.constant dense<0xFF800000> : vector<8xf32>
      %54 = vector.multi_reduction <maximumf>, %51, %cst_29 [1] : vector<8x128xf32> to vector<8xf32>
      %55 = vector.shape_cast %54 : vector<8xf32> to vector<8x1xf32>
      %56 = vector.broadcast %55 : vector<8x1xf32> to vector<8x128xf32>
      %57 = arith.subf %51, %56 : vector<8x128xf32>
      %58 = math.exp %57 : vector<8x128xf32>
      %cst_30 = arith.constant dense<0.000000e+00> : vector<8xf32>
      %59 = vector.multi_reduction <add>, %58, %cst_30 [1] : vector<8x128xf32> to vector<8xf32>
      %60 = vector.shape_cast %59 : vector<8xf32> to vector<8x1xf32>
      %61 = vector.broadcast %55 : vector<8x1xf32> to vector<8x128xf32>
      %62 = arith.subf %51, %61 : vector<8x128xf32>
      %63 = math.log %60 : vector<8x1xf32>
      %64 = vector.broadcast %63 : vector<8x1xf32> to vector<8x128xf32>
      %65 = arith.subf %62, %64 : vector<8x128xf32>
      %66 = tpu.reciprocal %60 {approx = true} : vector<8x1xf32> -> vector<8x1xf32>
      %67 = vector.broadcast %66 : vector<8x1xf32> to vector<8x128xf32>
      %68 = arith.mulf %58, %67 : vector<8x128xf32>
      %cst_31 = arith.constant dense<0xFF800000> : vector<8xf32>
      %69 = vector.multi_reduction <maximumf>, %53, %cst_31 [1] : vector<8x128xf32> to vector<8xf32>
      %70 = vector.shape_cast %69 : vector<8xf32> to vector<8x1xf32>
      %71 = vector.broadcast %70 : vector<8x1xf32> to vector<8x128xf32>
      %72 = arith.subf %53, %71 : vector<8x128xf32>
      %73 = math.exp %72 : vector<8x128xf32>
      %74 = vector.broadcast %70 : vector<8x1xf32> to vector<8x128xf32>
      %75 = arith.subf %53, %74 : vector<8x128xf32>
      %cst_32 = arith.constant dense<0.000000e+00> : vector<8xf32>
      %76 = vector.multi_reduction <add>, %73, %cst_32 [1] : vector<8x128xf32> to vector<8xf32>
      %77 = vector.shape_cast %76 : vector<8xf32> to vector<8x1xf32>
      %78 = math.log %77 : vector<8x1xf32>
      %79 = vector.broadcast %78 : vector<8x1xf32> to vector<8x128xf32>
      %80 = arith.subf %75, %79 : vector<8x128xf32>
      %81 = arith.subf %65, %80 : vector<8x128xf32>
      %82 = arith.mulf %68, %81 : vector<8x128xf32>
      %cst_33 = arith.constant dense<0.000000e+00> : vector<8xf32>
      %83 = vector.multi_reduction <add>, %82, %cst_33 [1] : vector<8x128xf32> to vector<8xf32>
      %84 = vector.shape_cast %83 : vector<8xf32> to vector<8x1xf32>
      %85 = arith.mulf %84, %27 : vector<8x1xf32>
      %86 = vector.shape_cast %85 : vector<8x1xf32> to vector<1x8x1xf32>
      %cst_34 = arith.constant dense<0.000000e+00> : vector<1xf32>
      %87 = vector.multi_reduction <add>, %86, %cst_34 [1, 2] : vector<1x8x1xf32> to vector<1xf32>
      %88 = vector.shape_cast %87 : vector<1xf32> to vector<1x1x1xf32>
      %89 = vector.extract %88[0, 0, 0] : f32 from vector<1x1x1xf32>
      %cst_35 = arith.constant 4.000000e+00 : f32
      %90 = arith.mulf %89, %cst_35 : f32
      %cst_36 = arith.constant 1.024000e+03 : f32
      %91 = arith.divf %90, %cst_36 : f32
      %cst_37 = arith.constant 5.000000e-01 : f32
      %92 = arith.mulf %49, %cst_37 : f32
      %cst_38 = arith.constant 5.000000e-01 : f32
      %93 = arith.mulf %91, %cst_38 : f32
      %94 = arith.addf %92, %93 : f32
      %95 = tpu.iota {dimensions = array<i32: 0>} : vector<8x128xi32>
      %96 = tpu.iota {dimensions = array<i32: 1>} : vector<8x128xi32>
      %c0_i32_39 = arith.constant 0 : i32
      %97 = vector.broadcast %c0_i32_39 : i32 to vector<8x128xi32>
      %98 = arith.cmpi eq, %95, %97 : vector<8x128xi32>
      %c0_i32_40 = arith.constant 0 : i32
      %99 = vector.broadcast %c0_i32_40 : i32 to vector<8x128xi32>
      %100 = arith.cmpi eq, %96, %99 : vector<8x128xi32>
      %101 = arith.andi %98, %100 : vector<8x128xi1>
      %cst_41 = arith.constant 0.000000e+00 : f32
      %102 = vector.broadcast %94 : f32 to vector<8x128xf32>
      %103 = vector.broadcast %cst_41 : f32 to vector<8x128xf32>
      %104 = arith.select %101, %102, %103 : vector<8x128xi1>, vector<8x128xf32>
      %105 = vector.shape_cast %104 : vector<8x128xf32> to vector<1x8x128xf32>
      %c0_42 = arith.constant 0 : index
      %c0_43 = arith.constant 0 : index
      %c0_44 = arith.constant 0 : index
      %106 = vector.load %arg8[%c0_42, %c0_43, %c0_44] : memref<1x8x128xf32, #tpu.memory_space<vmem>>, vector<1x8x128xf32>
      tpu.vector_store %arg8[%c0_42, %c0_43, %c0_44], %105 {strides = array<i32>} : memref<1x8x128xf32, #tpu.memory_space<vmem>>, vector<1x8x128xf32>,
    } else {
    }
    return
  }
  func.func @transform_0(%arg0: i32, %arg1: i32) -> (i32, i32) {
    %c0_i32 = arith.constant 0 : i32
    return %arg0, %arg1 : i32, i32
  }
  func.func @transform_1(%arg0: i32, %arg1: i32) -> (i32, i32) {
    %c0_i32 = arith.constant 0 : i32
    %c0_i32_0 = arith.constant 0 : i32
    return %arg1, %c0_i32 : i32, i32
  }
  func.func @transform_2(%arg0: i32, %arg1: i32) -> (i32, i32) {
    %c0_i32 = arith.constant 0 : i32
    %c0_i32_0 = arith.constant 0 : i32
    %c0_i32_1 = arith.constant 0 : i32
    return %c0_i32, %c0_i32_0 : i32, i32
  }
  func.func @transform_3(%arg0: i32, %arg1: i32) -> (i32, i32) {
    %c0_i32 = arith.constant 0 : i32
    %c0_i32_0 = arith.constant 0 : i32
    return %arg0, %c0_i32 : i32, i32
  }
  func.func @transform_4(%arg0: i32, %arg1: i32) -> (i32, i32) {
    %c0_i32 = arith.constant 0 : i32
    %c0_i32_0 = arith.constant 0 : i32
    return %arg0, %c0_i32 : i32, i32
  }
  func.func @transform_5(%arg0: i32, %arg1: i32) -> (i32, i32) {
    %c0_i32 = arith.constant 0 : i32
    %c0_i32_0 = arith.constant 0 : i32
    return %arg0, %c0_i32 : i32, i32
  }
  func.func @transform_6(%arg0: i32, %arg1: i32) -> (i32, i32, i32) {
    %c0_i32 = arith.constant 0 : i32
    %c0_i32_0 = arith.constant 0 : i32
    %c0_i32_1 = arith.constant 0 : i32
    return %arg0, %c0_i32, %c0_i32_0 : i32, i32, i32
  }
}

</mosaic_0001>

<bundles_post_ra>
// kernel: tpu_custom_call.1
= control target key start
LH: loop header
LB: loop body
LE: loop exit
PB: predicated region body
PF: predicated region fallthrough
CT: control target
= control target key end

     0   :  { %11 = vsyncpa [#allocation4], 0  ;;  %s607_s0 = inlined_call_operand.vmem [shape: bf16[8,256], index: 0, kind: input, shape index: {}]   ;;  %s608_s1 = inlined_call_operand.hbm [shape: bf16[256,128], index: 1, kind: input, shape index: {}]   ;;  %s609_s2 = inlined_call_operand.hbm [shape: f32[1,128], index: 2, kind: input, shape index: {}]   ;;  %s610_s3 = inlined_call_operand.vmem [shape: f32[8,128], index: 3, kind: input, shape index: {}]   ;;  %s611_s4 = inlined_call_operand.vmem [shape: f32[8,128], index: 4, kind: input, shape index: {}]   ;;  %s612_s5 = inlined_call_operand.vmem [shape: s32[8,1], index: 5, kind: input, shape index: {}]   ;;  %s613_s6 = inlined_call_operand.hbm [shape: f32[1,8,128], index: 6, kind: output, shape index: {}]  }
   0x1   :  { %12 = vsyncpa [#allocation7], 0 }
   0x2   :  { %13 = vsyncpa [#allocation5], 0  ;;  %s518_s21 = smov [#allocation3]   ;;  %s446_s25 = scalar_lea.hbm %s608_s1, 2048 }
   0x3   :  { %s21_s22 = sshll.u32 %s518_s21, 4  ;;  %p447_p0 = scmp.ne.s32.totalorder %s608_s1, %s446_s25  ;;  %s22_s22 = int_to_ptr.vmem [resolvable:$true] %s21_s22 }
   0x4   :  { %p450_p1 = scmp.lt.u32.totalorder %s446_s25, %s608_s1 }
   0x6   :  { %p452_p2 = pnand %p450_p1, %p447_p0 }
   0x8   :  { %455 = shalt.err (!%p452_p2)
}
   0x9   :  { %s456_s30 = scalar_lea.vmem %s22_s22, 2048  ;;  %p461_p4 = scmp.lt.s32.totalorder %s22_s22, %s22_s22 }
   0xa   :  { %p457_p3 = scmp.ne.s32.totalorder %s22_s22, %s456_s30  ;;  %p462_p5 = scmp.lt.s32.totalorder %s456_s30, %s456_s30 }
   0xc   :  { %p463_p6 = por %p462_p5, %p461_p4 }
   0xe   :  { %p464_p7 = pnand %p463_p6, %p457_p3 }
  0x10   :  { %467 = shalt.err (!%p464_p7)
}
  0x11   :  { %s519_s7 = smov 64   ;;  %s520_s8 = smov 4  }
  0x12   :  { %27 = dma.hbm_to_vmem [thread:$0]  %s608_s1, 2048, %s22_s22, [#allocation4], %s519_s7, %s519_s7, %s520_s8  }
  0x13   :  { %s521_s11 = smov [#allocation6]   ;;  %s468_s15 = scalar_lea.hbm %s609_s2, 16 }
  0x14   :  { %s34_s12 = sshll.u32 %s521_s11, 4  ;;  %p469_p8 = scmp.ne.s32.totalorder %s609_s2, %s468_s15  ;;  %s35_s12 = int_to_ptr.vmem [resolvable:$true] %s34_s12 }
  0x15   :  { %p472_p9 = scmp.lt.u32.totalorder %s468_s15, %s609_s2 }
  0x17   :  { %p474_p10 = pnand %p472_p9, %p469_p8 }
  0x19   :  { %477 = shalt.err (!%p474_p10)
}
  0x1a   :  { %s478_s20 = scalar_lea.vmem %s35_s12, 16  ;;  %s482_s1 = scalar_lea.vmem %s35_s12, 32 }
  0x1b   :  { %p479_p11 = scmp.ne.s32.totalorder %s35_s12, %s478_s20  ;;  %p483_p12 = scmp.lt.s32.totalorder %s35_s12, %s35_s12 }
  0x1c   :  { %p484_p13 = scmp.lt.s32.totalorder %s482_s1, %s478_s20 }
  0x1e   :  { %p485_p0 = por %p484_p13, %p483_p12 }
  0x20   :  { %p486_p1 = pnand %p485_p0, %p479_p11 }
  0x22   :  { %489 = shalt.err (!%p486_p1)
}
  0x23   :  { %37 = dma.hbm_to_vmem [thread:$0]  %s609_s2, 16, %s35_s12, [#allocation7]  }
  0x24   :  { %512 = dma.done.wait [#allocation4], 2048  }
  0x25   :  { %513 = vsyncadd [#allocation4], 4294965248 }
  0x26   :  { %514 = dma.done.wait [#allocation7], 16  }
  0x27   :  { %515 = vsyncadd [#allocation7], 4294967280  ;;  %v414_v0 = vld [vmem:[#allocation3 + $0x40] sm:$0xff]   ;;  %v416_v2 = vld [vmem:[#allocation3 + $0x48] sm:$0xff]   ;;  %v522_v30 = vmov 0   ;;  %v250_v44 = vlaneseq  ;;  %vm279_vm1 = vcmask 7168  }
  0x28   :  { %v415_v1 = vld [vmem:[#allocation3] sm:$0xff]   ;;  %380 = vmatprep.subr.bf16.mxu0 %v414_v0  ;;  %v417_v3 = vld [vmem:[#allocation3 + $0x8] sm:$0xff]   ;;  %v418_v4 = vld [vmem:[#allocation3 + $0x50] sm:$0xff]   ;;  %412 = vset.pattern.permute.xlu1 %v522_v30  ;;  %s523_s9 = smov [#allocation8]  }
  0x29   :  { %381 = vmatpush3.bf16.msra.mxu0 %v415_v1  ;;  %v419_v5 = vld [vmem:[#allocation3 + $0x10] sm:$0xff]   ;;  %v420_v6 = vld [vmem:[#allocation3 + $0x58] sm:$0xff]   ;;  %v422_v8 = vld [vmem:[#allocation3 + $0x60] sm:$0xff]   ;;  %413 = vset.pattern.permute.xlu0 %v522_v30  ;;  %v251_v46 = vand.u32 127, %v250_v44  ;;  %s351_s10 = sshll.u32 %s523_s9, 4  ;;  %s352_s10 = int_to_ptr.vmem [resolvable:$true] %s351_s10 }
  0x2a   :  { %382 = vmatprep.subr.bf16.mxu0 %v416_v2  ;;  %v421_v7 = vld [vmem:[#allocation3 + $0x18] sm:$0xff]   ;;  %v423_v9 = vld [vmem:[#allocation3 + $0x20] sm:$0xff]   ;;  %v424_v10 = vld [vmem:[#allocation3 + $0x68] sm:$0xff]   ;;  %s490_s12 = scalar_lea.vmem %s352_s10, 128  ;;  %p495_p3 = scmp.lt.s32.totalorder %s352_s10, %s352_s10 }
  0x2b   :  { %v57_v11 = vld [vmem:[%s607_s0] sm:$0xff]  ;;  %v425_v13 = vld [vmem:[#allocation3 + $0x28] sm:$0xff]   ;;  %v426_v14 = vld [vmem:[#allocation3 + $0x70] sm:$0xff]   ;;  %vm340_vm2 = vcmp.eq.s32.totalorder %v251_v46, 0  ;;  %p491_p2 = scmp.ne.s32.totalorder %s352_s10, %s490_s12  ;;  %p496_p4 = scmp.lt.s32.totalorder %s490_s12, %s490_s12 }
  0x2c   :  { %v362_v12 = vcombine.high %v57_v11, %v57_v11  ;;  %v427_v15 = vld [vmem:[#allocation3 + $0x30] sm:$0xff]   ;;  %v428_v16 = vld [vmem:[#allocation3 + $0x78] sm:$0xff]   ;;  %v361_v18 = vcombine.low %v57_v11, %v57_v11  ;;  %v247_v19 = vld [vmem:[%s610_s3] sm:$0xff] }
  0x2d   :  { %383 = vmatpush3.bf16.msra.mxu0 %v417_v3  ;;  %v429_v17 = vld [vmem:[#allocation3 + $0x38] sm:$0xff]   ;;  %260 = vmax.xlane.f32.xlu1 %v247_v19  ;;  %v379_v22 = vld [vmem:[#allocation6] ss:$0 sm:$0xff]  ;;  %p497_p5 = por %p496_p4, %p495_p3 }
  0x2e   :  { %384 = vmatprep.subr.bf16.mxu0 %v418_v4  ;;  %225 = vmatprep.mubr.bf16.mxu0 %v362_v12  ;;  %v248_v27 = vld [vmem:[%s611_s4] sm:$0xff] }
  0x2f   :  { %v294_v29 = vmul.f32 0.5, %v248_v27  ;;  %v249_v43 = vld [vmem:[%s612_s5] sm:$0xff]  ;;  %p498_p6 = pnand %p497_p5, %p491_p2 }
  0x31   :  { %385 = vmatpush3.bf16.msra.mxu0 %v419_v5 }
  0x32   :  { %386 = vmatprep.subr.bf16.mxu0 %v420_v6 }
  0x35   :  { %387 = vmatpush3.bf16.msra.mxu0 %v421_v7 }
  0x36   :  { %388 = vmatprep.subr.bf16.mxu0 %v422_v8 }
  0x39   :  { %389 = vmatpush3.bf16.msra.mxu0 %v423_v9 }
  0x3a   :  { %390 = vmatprep.subr.bf16.mxu0 %v424_v10 }
  0x3d   :  { %391 = vmatpush3.bf16.msra.mxu0 %v425_v13 }
  0x3e   :  { %392 = vmatprep.subr.bf16.mxu0 %v426_v14 }
  0x41   :  { %393 = vmatpush3.bf16.msra.mxu0 %v427_v15 }
  0x42   :  { %394 = vmatprep.subr.bf16.mxu0 %v428_v16 }
  0x45   :  { %395 = vmatpush3.bf16.msra.mxu0 %v429_v17 }
  0x48   :  { %226 = vmatmul.mubr.bf16.vlgmr.msra.gmra.mrb[0].mxu0 %v361_v18 }
  0xba   :  { %v261_v32 = vpop.xlane.xlu1 %260 }
  0xbb   :  { %v262_v35 = vsub.f32 %v247_v19, %v261_v32 }
  0xbd   :  { %v263_v39 = vmul.f32 1.442695, %v262_v35 }
 0x11b   :  { %v396_v20 = vpop.f32.mrb[0].mxu0 }
 0x11c   :  { %v397_v21 = vpop.f32.mrb[1].mxu0 }
 0x11d   :  { %v398_v23 = vadd.f32 %v397_v21, %v396_v20  ;;  %v399_v24 = vpop.f32.mrb[2].mxu0 }
 0x11e   :  { %v400_v25 = vpop.f32.mrb[3].mxu0 }
 0x11f   :  { %v246_v26 = vadd.f32 %v398_v23, %v379_v22 }
 0x121   :  { %v293_v28 = vmul.f32 0.5, %v246_v26 }
 0x123   :  { %295 = vmax.xlane.f32.xlu0 %v293_v28 }
 0x127   :  { %307 = vmax.xlane.f32.xlu0 %v294_v29 }
 0x1b0   :  { %v296_v31 = vpop.xlane.xlu0 %295 }
 0x1b1   :  { %v297_v33 = vsub.f32 %v293_v28, %v296_v31 }
 0x1b3   :  { %v298_v34 = vmul.f32 1.442695, %v297_v33 }
 0x1b4   :  { %v308_v36 = vpop.xlane.xlu0 %307 }
 0x1b5   :  { %432 = vpow2.f32 %v298_v34  ;;  %v309_v37 = vsub.f32 %v294_v29, %v308_v36 }
 0x1b7   :  { %v310_v38 = vmul.f32 1.442695, %v309_v37 }
 0x1b9   :  { %434 = vpow2.f32 %v310_v38 }
 0x1ba   :  { %436 = vpow2.f32 %v263_v39 }
 0x1bf   :  { %v433_v40 = vpop.eup %432 }
 0x1c0   :  { %300 = vadd.xlane.f32.xlu1 %v433_v40 }
 0x1c3   :  { %v435_v41 = vpop.eup %434 }
 0x1c4   :  { %312 = vadd.xlane.f32.xlu0 %v435_v41  ;;  %v437_v42 = vpop.eup %436 }
 0x1c8   :  { %265 = vadd.xlane.f32.xlu0 %v437_v42 }
 0x1d1   :  { %271 = vperm.xlu1 %412, %v249_v43  }
 0x24d   :  { %v301_v45 = vpop.xlane.xlu1 %300 }
 0x24e   :  { %438 = vlog2.f32 %v301_v45 }
 0x251   :  { %v272_v47 = vpop.permute.xlu1 %271  ;;  %v313_v48 = vpop.xlane.xlu0 %312 }
 0x252   :  { %vm273_vm0 = vcmp.eq.s32.totalorder %v251_v46, %v272_v47  ;;  %440 = vlog2.f32 %v313_v48 }
 0x253   :  { %v274_v49 = vsel %vm273_vm0, %v247_v19, 0.0  ;;  %442 = vrcp.f32 %v301_v45  ;;  %v254_v19 = vshrl.u32 %v250_v44, 7 }
 0x254   :  { %275 = vadd.xlane.f32.xlu0 %v274_v49 }
 0x255   :  { %v266_v60 = vpop.xlane.xlu0 %265  ;;  %vm339_vm3 = vcmp.eq.s32.totalorder %v254_v19, 0 }
 0x256   :  { %444 = vlog2.f32 %v266_v60  ;;  %vm341_vm4 = vmand %vm339_vm3, %vm340_vm2 }
 0x258   :  { %v439_v50 = vpop.eup %438 }
 0x259   :  { %v303_v51 = vmul.f32 0.6931472, %v439_v50 }
 0x25b   :  { %v304_v56 = vsub.f32 %v297_v33, %v303_v51 }
 0x25c   :  { %v441_v52 = vpop.eup %440 }
 0x25d   :  { %v315_v53 = vmul.f32 0.6931472, %v441_v52  ;;  %v443_v54 = vpop.eup %442 }
 0x25e   :  { %v306_v57 = vmul.f32 %v443_v54, %v433_v40 }
 0x25f   :  { %v316_v55 = vsub.f32 %v309_v37, %v315_v53 }
 0x260   :  { %v445_v61 = vpop.eup %444 }
 0x261   :  { %v317_v58 = vsub.f32 %v304_v56, %v316_v55  ;;  %v268_v62 = vmul.f32 0.6931472, %v445_v61 }
 0x263   :  { %v318_v59 = vmul.f32 %v317_v58, %v306_v57  ;;  %v269_v63 = vadd.f32 %v268_v62, %v261_v32 }
 0x265   :  { %319 = vadd.xlane.f32.xlu0 %v318_v59 }
 0x2e1   :  { %v276_v0 = vpop.xlane.xlu0 %275 }
 0x2e2   :  { %v277_v1 = vsub.f32 %v269_v63, %v276_v0 }
 0x2e4   :  { %v280_v2 = vsel %vm279_vm1, %v277_v1, 0.0 }
 0x2e5   :  { %281 = vadd.xlane.f32.xlu0 %v280_v2 }
 0x2f2   :  { %v320_v3 = vpop.xlane.xlu0 %319 }
 0x2f3   :  { %v322_v4 = vsel %vm279_vm1, %v320_v3, 0.0 }
 0x2f4   :  { %323 = vadd.xlane.f32.xlu1 %v322_v4 }
 0x372   :  { %v282_v5 = vpop.xlane.xlu0 %281 }
 0x373   :  { %v283_v6 = vrot.slane %v282_v5, 4 }
 0x375   :  { %v284_v7 = vadd.f32 %v283_v6, %v282_v5 }
 0x377   :  { %v285_v8 = vrot.slane %v284_v7, 2 }
 0x379   :  { %v286_v9 = vadd.f32 %v285_v8, %v284_v7 }
 0x37b   :  { %v287_v10 = vrot.slane %v286_v9, 1 }
 0x37d   :  { %v288_v11 = vadd.f32 %v287_v10, %v286_v9 }
 0x37f   :  { %402 = vpush %v288_v11 }
 0x381   :  { %v324_v12 = vpop.xlane.xlu1 %323 }
 0x382   :  { %v325_v13 = vrot.slane %v324_v12, 4 }
 0x384   :  { %v326_v14 = vadd.f32 %v325_v13, %v324_v12 }
 0x386   :  { %v327_v15 = vrot.slane %v326_v14, 2 }
 0x388   :  { %v328_v16 = vadd.f32 %v327_v15, %v326_v14 }
 0x38a   :  { %v329_v17 = vrot.slane %v328_v16, 1 }
 0x38c   :  { %v330_v18 = vadd.f32 %v329_v17, %v328_v16 }
 0x38e   :  { %404 = vpush %v330_v18 }
 0x3b0   :  { %s403_s5 = spop %402 }
 0x3b1   :  { %s292_s27 = smul.f32 0.125, %s403_s5 }
 0x3b3   :  { %s336_s7 = smul.f32 0.5, %s292_s27 }
 0x3bf   :  { %s405_s28 = spop %404 }
 0x3c0   :  { %s332_s29 = smul.f32 4.0, %s405_s28 }
 0x3c2   :  { %s335_s30 = smul.f32 0.0009765625, %s332_s29 }
 0x3c4   :  { %s337_s8 = smul.f32 0.5, %s335_s30 }
 0x3c6   :  { %s338_s11 = sadd.f32 %s337_s8, %s336_s7 }
 0x3c8   :  { %v342_v20 = vstv %s338_s11 }
 0x3c9   :  { %v343_v21 = vsel %vm341_vm4, %v342_v20, 0.0 }
 0x3ca   :  { %344 = vst [vmem:[#allocation8] sm:$0xff] %v343_v21 }
 0x3cb   :  { %501 = shalt.err (!%p498_p6)
}
 0x3cc   :  { %s502_s15 = scalar_lea.hbm %s613_s6, 128 }
 0x3cd   :  { %p503_p7 = scmp.ne.s32.totalorder %s613_s6, %s502_s15  ;;  %p506_p8 = scmp.lt.u32.totalorder %s502_s15, %s613_s6 }
 0x3cf   :  { %p508_p9 = pnand %p506_p8, %p503_p7 }
 0x3d1   :  { %511 = shalt.err (!%p508_p9)
}
 0x3d2   :  { %354 = dma.vmem_to_hbm [thread:$0]  %s352_s10, 128, %s613_s6, [#allocation5]  }
 0x3d3   :  { %516 = dma.done.wait [#allocation5], 128  }
 0x3d4   :  { %517 = vsyncadd [#allocation5], 4294967168 }
 0x3d5   :  { %358 = vsyncpa [#allocation4], 1 }
 0x3d6   :  { %359 = vsyncpa [#allocation7], 1 }
 0x3d7   :  { %360 = vsyncpa [#allocation5], 1 }

</bundles_post_ra>
